<compile_context>
chip_gen: v7x
topology: tpu7x:2x2x1
jax: 0.10.0
libtpu: 0.0.40
codegen_flags: <defaults>
</compile_context>

<pallas_src>
import jax
import jax.numpy as jnp
from jax.experimental import pallas as pl
from jax.experimental.pallas import tpu as pltpu


_TARGET_TILE_BYTES = 4 << 20          # ~4 MiB per VMEM tile (all chips)
_VMEM_LIMIT_BYTES = 32 << 20          # 2 in + 2 out buffers (~16 MiB) + headroom
_LANE_CANDIDATES = (1024, 512, 256, 128)


def _identity_kernel(x_ref, o_ref):
    # Pure pass-through of the current VMEM tile; no extra elementwise work.
    o_ref[...] = x_ref[...]


def _sublane_multiple(dtype) -> int:
    """Sublane granularity for the dtype (8 f32, 16 bf16, 32 int8)."""
    itemsize = jnp.dtype(dtype).itemsize
    return max(8, 32 // max(1, itemsize))


def _pick_lanes(total: int):
    """Largest lane-dense width (multiple of 128) that divides `total`."""
    for lanes in _LANE_CANDIDATES:
        if total % lanes == 0:
            return lanes
    return None


def base_feature_extractor_forward(x):
    """Pallas identity pass-through matching BaseFeatureExtractor.forward.

    Returns a tensor numerically identical to `x` (same shape, dtype). The
    copy runs as a tiled, pipelined, lane-dense Pallas kernel when the
    element count is lane-friendly; otherwise `x` is returned unchanged
    (forward() is a semantic identity, so no extra HBM traffic is spent).
    """
    if x.size == 0:
        # Zero-size guard: a zero-extent BlockSpec / grid would be invalid.
        return x

    total = x.size
    lanes = _pick_lanes(total)
    if lanes is None:
        # Not a multiple of 128 lanes: skip the copy rather than pad+slice
        # (each of those is a full extra HBM pass outside the kernel).
        return x

    rows = total // lanes
    x2d = x.reshape(rows, lanes)

    itemsize = jnp.dtype(x.dtype).itemsize
    sub = _sublane_multiple(x.dtype)

    # Byte-based tile sizing, rounded down to the sublane multiple.
    target_rows = (_TARGET_TILE_BYTES // (lanes * itemsize)) // sub * sub
    target_rows = max(sub, target_rows)

    # Cap so the grid has >= 2 programs when the input is big enough, keeping
    # both v7x TensorCores busy under dimension_semantics=("parallel",).
    half_rows = -(-rows // 2)                  # ceil(rows / 2)
    half_rows = -(-half_rows // sub) * sub     # round up to sublane multiple
    tile_r = min(target_rows, half_rows)

    if tile_r >= rows:
        # Whole slab in one block: full-extent block shape satisfies the
        # (8, 128) rule by equaling the array dims.
        tile_r = rows

    grid = (pl.cdiv(rows, tile_r),)

    out2d = pl.pallas_call(
        _identity_kernel,
        out_shape=jax.ShapeDtypeStruct((rows, lanes), x2d.dtype),
        grid_spec=pl.GridSpec(
            grid=grid,
            in_specs=[pl.BlockSpec((tile_r, lanes), lambda i: (i, 0))],
            out_specs=pl.BlockSpec((tile_r, lanes), lambda i: (i, 0)),
        ),
        compiler_params=pltpu.CompilerParams(
            dimension_semantics=("parallel",),
            vmem_limit_bytes=_VMEM_LIMIT_BYTES,
        ),
    )(x2d)

    return out2d.reshape(x.shape)


class BaseFeatureExtractorJAX:
    """Mirror of the PyTorch base-class API (no parameters)."""

    def __init__(self):
        # No parameters / submodules in the PyTorch __init__.
        pass

    def forward(self, *inputs):
        if not inputs:
            return None
        # Identity pass-through of the first input via the Pallas kernel.
        return base_feature_extractor_forward(inputs[0])

    def output_num(self):
        # Stub in PyTorch as well.
        return None

    def train(self, mode=True):
        # No BatchNorm2d children exist in the base class; nothing to freeze.
        return self


if __name__ == "__main__":
    key = jax.random.PRNGKey(0)
    # Small NCHW input consistent with an image feature extractor.
    x = jax.random.normal(key, (2, 4, 16, 16), dtype=jnp.float32)

    model = BaseFeatureExtractorJAX()
    y = model.forward(x)
    y = jax.block_until_ready(y)

    assert y.shape == x.shape and y.dtype == x.dtype
    assert bool(jnp.allclose(y, x))
    print("KERNEL_OK")
</pallas_src>

<mosaic_0001>
module attributes {stable_mosaic.version = 11 : i64} {
  func.func @_identity_kernel(%arg0: i32, %arg1: memref<2x1024xf32, #tpu.memory_space<vmem>>, %arg2: memref<2x1024xf32, #tpu.memory_space<vmem>>) attributes {dimension_semantics = [#tpu.dimension_semantics<parallel>], iteration_bounds = array<i64: 1>, scalar_prefetch = 0 : i64, scratch_operands = 0 : i64, tpu.core_type = #tpu.core_type<tc>, window_params = [{transform_indices = @transform_0, window_bounds = array<i64: 2, 1024>}, {transform_indices = @transform_1, window_bounds = array<i64: 2, 1024>}]} {
    %c0 = arith.constant 0 : index
    %c0_0 = arith.constant 0 : index
    %0 = vector.load %arg1[%c0, %c0_0] : memref<2x1024xf32, #tpu.memory_space<vmem>>, vector<2x1024xf32>
    %c0_1 = arith.constant 0 : index
    %c0_2 = arith.constant 0 : index
    %1 = vector.load %arg2[%c0_1, %c0_2] : memref<2x1024xf32, #tpu.memory_space<vmem>>, vector<2x1024xf32>
    tpu.vector_store %arg2[%c0_1, %c0_2], %0 {strides = array<i32>} : memref<2x1024xf32, #tpu.memory_space<vmem>>, vector<2x1024xf32>,
    return
  }
  func.func @transform_0(%arg0: i32) -> (i32, i32) {
    %c0_i32 = arith.constant 0 : i32
    %c0_i32_0 = arith.constant 0 : i32
    return %arg0, %c0_i32 : i32, i32
  }
  func.func @transform_1(%arg0: i32) -> (i32, i32) {
    %c0_i32 = arith.constant 0 : i32
    %c0_i32_0 = arith.constant 0 : i32
    return %arg0, %c0_i32 : i32, i32
  }
}

</mosaic_0001>

<bundles_post_ra>
// kernel: tpu_custom_call.1
= control target key start
LH: loop header
LB: loop body
LE: loop exit
PB: predicated region body
PF: predicated region fallthrough
CT: control target
= control target key end

     0   :  { %6 = vsyncpa [#allocation3], 0  ;;  %s126_s0 = inlined_call_operand.hbm [shape: f32[2,1024], index: 0, kind: input, shape index: {}]   ;;  %s127_s1 = inlined_call_operand.hbm [shape: f32[2,1024], index: 1, kind: output, shape index: {}]  }
   0x1   :  { %7 = vsyncpa [#allocation4], 0  ;;  %s90_s6 = smov [#allocation2]   ;;  %s42_s10 = scalar_lea.hbm %s126_s0, 256 }
   0x2   :  { %s14_s7 = sshll.u32 %s90_s6, 4  ;;  %p43_p0 = scmp.ne.s32.totalorder %s126_s0, %s42_s10  ;;  %s15_s7 = int_to_ptr.vmem [resolvable:$true] %s14_s7 }
   0x3   :  { %p46_p1 = scmp.lt.u32.totalorder %s42_s10, %s126_s0 }
   0x5   :  { %p48_p2 = pnand %p46_p1, %p43_p0 }
   0x7   :  { %51 = shalt.err (!%p48_p2)
}
   0x8   :  { %s52_s15 = scalar_lea.vmem %s15_s7, 256  ;;  %p57_p4 = scmp.lt.s32.totalorder %s15_s7, %s15_s7 }
   0x9   :  { %p53_p3 = scmp.ne.s32.totalorder %s15_s7, %s52_s15  ;;  %p58_p5 = scmp.lt.s32.totalorder %s52_s15, %s52_s15 }
   0xb   :  { %p59_p6 = por %p58_p5, %p57_p4 }
   0xd   :  { %p60_p7 = pnand %p59_p6, %p53_p3 }
   0xf   :  { %63 = shalt.err (!%p60_p7)
}
  0x10   :  { %17 = dma.hbm_to_vmem [thread:$0]  %s126_s0, 256, %s15_s7, [#allocation3]  }
  0x11   :  { %86 = dma.done.wait [#allocation3], 256  }
  0x12   :  { %87 = vsyncadd [#allocation3], 4294967040  ;;  %s91_s18 = smov [#allocation5]   ;;  %v21_v0 = vld [vmem:[#allocation2] sm:$0xff]  ;;  %v22_v1 = vld [vmem:[#allocation2 + $0x8] sm:$0xff] }
  0x13   :  { %s31_s19 = sshll.u32 %s91_s18, 4  ;;  %23 = vst [vmem:[#allocation5] sm:$0xff] %v21_v0  ;;  %24 = vst [vmem:[#allocation5 + $0x8] sm:$0xff] %v22_v1  ;;  %s32_s19 = int_to_ptr.vmem [resolvable:$true] %s31_s19 }
  0x14   :  { %s64_s20 = scalar_lea.vmem %s32_s19, 256  ;;  %p69_p9 = scmp.lt.s32.totalorder %s32_s19, %s32_s19 }
  0x15   :  { %p65_p8 = scmp.ne.s32.totalorder %s32_s19, %s64_s20  ;;  %p70_p10 = scmp.lt.s32.totalorder %s64_s20, %s64_s20 }
  0x17   :  { %p71_p11 = por %p70_p10, %p69_p9 }
  0x19   :  { %p72_p12 = pnand %p71_p11, %p65_p8 }
  0x1b   :  { %75 = shalt.err (!%p72_p12)
}
  0x1c   :  { %s76_s0 = scalar_lea.hbm %s127_s1, 256 }
  0x1d   :  { %p77_p13 = scmp.ne.s32.totalorder %s127_s1, %s76_s0  ;;  %p80_p0 = scmp.lt.u32.totalorder %s76_s0, %s127_s1 }
  0x1f   :  { %p82_p1 = pnand %p80_p0, %p77_p13 }
  0x21   :  { %85 = shalt.err (!%p82_p1)
}
  0x22   :  { %34 = dma.vmem_to_hbm [thread:$0]  %s32_s19, 256, %s127_s1, [#allocation4]  }
  0x23   :  { %88 = dma.done.wait [#allocation4], 256  }
  0x24   :  { %89 = vsyncadd [#allocation4], 4294967040 }
  0x25   :  { %38 = vsyncpa [#allocation3], 1 }
  0x26   :  { %39 = vsyncpa [#allocation4], 1 }

</bundles_post_ra>
